<compile_context>
chip_gen: v5e
topology: v5e:2x2
jax: 0.10.0
libtpu: 0.0.40
codegen_flags: <defaults>
</compile_context>

<pallas_src>
import functools

import jax
import jax.numpy as jnp
from jax import lax
from jax.experimental import pallas as pl
from jax.experimental.pallas import tpu as pltpu


def _lrn_kernel(x_ref, o_ref, *, C, pad, scale, offset):
    # x_ref / o_ref: (R, T) block.  R = bblk*C rows (whole batch elements
    # stacked along sublanes), T = lane tile of the flattened spatial dim.
    x = x_ref[...]                                    # (R, T) f32
    xsq = x * x
    R = x_ref.shape[0]

    # Channel index of each row within its own batch element (R % C == 0).
    ch = lax.broadcasted_iota(jnp.int32, (R, 1), 0) % C

    # Hoisted 0/1 tap masks: tap c+d exists iff ch < C-d, tap c-d iff ch >= d.
    masks = [((ch < C - d).astype(x.dtype), (ch >= d).astype(x.dtype))
             for d in range(1, pad + 1)]

    # Sliding-window channel sum on the XLU (rolls) + VPU (mul/add).
    # pltpu.roll(v, shift=s, axis=0)[c] == v[(c - s) mod R]; any wrapped row
    # crosses a batch-element boundary and is always zeroed by the masks
    # (block rows are a multiple of C), matching AvgPool3d's zero padding.
    acc = xsq
    for d in range(1, pad + 1):
        m_up, m_dn = masks[d - 1]
        up = pltpu.roll(xsq, shift=(R - d) % R, axis=0)   # row c sees xsq[c + d]
        dn = pltpu.roll(xsq, shift=d % R, axis=0)         # row c sees xsq[c - d]
        acc = acc + m_up * up + m_dn * dn

    # div = ((acc / N) * alfa + k) * beta  ==  acc * (alfa*beta/N) + k*beta
    div = acc * scale + offset
    # EUP-seeded reciprocal + one Newton step: full f32 precision with the
    # seed off the VALU slot (div >= k*beta > 0, well conditioned).
    r = pl.reciprocal(div, approx=True)
    r = r * (2.0 - div * r)
    o_ref[...] = (x * r).astype(o_ref.dtype)


def _pick_tiles(B, C, HW, itemsize, target_bytes=2 << 20):
    """Pick (rows-per-block, lane-tile).

    Blocks hold whole batch elements (rows a multiple of C) so the in-kernel
    channel masks stay valid.  The lane tile is a multiple of 128 (or the full
    spatial extent) and blocks target ~1-2 MiB so the HBM pipeline runs near
    roofline while 4x double-buffered block bytes stay < 8 MiB.
    """
    rows = B * C

    # Row block: fewest whole batch elements with rows-per-block % 8 == 0.
    # NOTE: for sub-f32 dtypes this should require %16 (bf16) / %32 (int8).
    bblk = next((c for c in range(1, B + 1)
                 if B % c == 0 and (c * C) % 8 == 0), None)
    R = rows if bblk is None else bblk * C   # fallback: full row extent

    # Lane tile: multiples of 128; the grid uses cdiv so the ragged trailing
    # spatial block is handled by Pallas.
    nchunks = pl.cdiv(HW, 128)
    max_chunks = max(1, target_bytes // (R * 128 * itemsize))
    nsp = pl.cdiv(nchunks, max_chunks)
    if rows // R == 1 and nsp == 1 and nchunks >= 2:
        nsp = 2                       # keep >=2 grid steps for the 2 TCs (v7x)
    hw_t = HW if nsp == 1 else pl.cdiv(nchunks, nsp) * 128

    # If one spatial block still undershoots the byte target, pack more whole
    # batch elements per block (stop before collapsing to a single row block,
    # so the grid stays splittable across cores).
    if bblk is not None and nsp == 1:
        while True:
            nxt = next((c for c in range(bblk + 1, B)
                        if B % c == 0 and (c * C) % 8 == 0), None)
            if nxt is None or nxt * C * hw_t * itemsize > target_bytes:
                break
            bblk = nxt
        R = bblk * C

    return R, hw_t


def lrn_pallas(x, N, k=2.0, a=0.001, b=0.75):
    """x: (B, C, H, W) float32, NCHW. Returns same shape/dtype."""
    B, C, H, W = x.shape
    pad = (N - 1) // 2
    assert C + 2 * pad - N + 1 == C, "channel dim must be preserved (use odd N)"

    HW = H * W
    rows = B * C
    itemsize = jnp.dtype(x.dtype).itemsize
    R, hw_t = _pick_tiles(B, C, HW, itemsize)

    x2d = x.reshape(rows, HW)

    scale = float(a) * float(b) / float(N)
    offset = float(k) * float(b)

    kernel = functools.partial(_lrn_kernel, C=C, pad=pad, scale=scale, offset=offset)

    grid = (rows // R, pl.cdiv(HW, hw_t))

    cost = pl.CostEstimate(
        flops=(4 * pad + 7) * rows * HW,
        transcendentals=rows * HW,
        bytes_accessed=2 * rows * HW * itemsize,
    )

    out = pl.pallas_call(
        kernel,
        out_shape=jax.ShapeDtypeStruct((rows, HW), x.dtype),
        grid_spec=pltpu.PrefetchScalarGridSpec(
            num_scalar_prefetch=0,
            grid=grid,
            in_specs=[pl.BlockSpec((R, hw_t), lambda bi, hi: (bi, hi))],
            out_specs=pl.BlockSpec((R, hw_t), lambda bi, hi: (bi, hi)),
        ),
        compiler_params=pltpu.CompilerParams(
            dimension_semantics=("parallel", "parallel")),
        cost_estimate=cost,
    )(x2d)

    return out.reshape(B, C, H, W)


def lrn_reference(x, N, k=2.0, a=0.001, b=0.75):
    """Pure-JAX reference matching the PyTorch module exactly."""
    B, C, H, W = x.shape
    pad = (N - 1) // 2
    xsq = x * x
    xsq_p = jnp.pad(xsq, ((0, 0), (pad, pad), (0, 0), (0, 0)))
    # AvgPool3d with count_include_pad=True divides by kernel size N.
    avg = sum(xsq_p[:, d:d + C, :, :] for d in range(N)) / float(N)
    div = (avg * a + k) * b
    return x / div


if __name__ == "__main__":
    key = jax.random.PRNGKey(0)
    B, C, H, W = 2, 4, 16, 16
    N = 5  # AlexNet-style LRN window (odd -> channel dim preserved)

    x = jax.random.normal(key, (B, C, H, W), dtype=jnp.float32)

    out = lrn_pallas(x, N)
    out = jax.block_until_ready(out)

    ref = lrn_reference(x, N)
    assert out.shape == x.shape and out.dtype == x.dtype
    assert jnp.allclose(out, ref, atol=1e-5, rtol=1e-5), "mismatch vs reference"

    print("KERNEL_OK")
</pallas_src>

<mosaic_0001>
module attributes {stable_mosaic.version = 11 : i64} {
  func.func @_lrn_kernel(%arg0: i32, %arg1: i32, %arg2: memref<8x128xf32, #tpu.memory_space<vmem>>, %arg3: memref<8x128xf32, #tpu.memory_space<vmem>>) attributes {dimension_semantics = [#tpu.dimension_semantics<parallel>, #tpu.dimension_semantics<parallel>], iteration_bounds = array<i64: 1, 2>, scalar_prefetch = 0 : i64, scratch_operands = 0 : i64, tpu.core_type = #tpu.core_type<tc>, window_params = [{transform_indices = @transform_0, window_bounds = array<i64: 8, 128>}, {transform_indices = @transform_1, window_bounds = array<i64: 8, 128>}]} {
    %c0 = arith.constant 0 : index
    %c0_0 = arith.constant 0 : index
    %0 = vector.load %arg2[%c0, %c0_0] : memref<8x128xf32, #tpu.memory_space<vmem>>, vector<8x128xf32>
    %1 = arith.mulf %0, %0 : vector<8x128xf32>
    %2 = tpu.iota {dimensions = array<i32: 0>} : vector<8x1xi32>
    %c4_i32 = arith.constant 4 : i32
    %c0_i32 = arith.constant 0 : i32
    %3 = arith.cmpi eq, %c4_i32, %c0_i32 : i32
    %c1_i32 = arith.constant 1 : i32
    %4 = arith.select %3, %c1_i32, %c4_i32 : i32
    %5 = vector.broadcast %4 : i32 to vector<8x1xi32>
    %6 = arith.remsi %2, %5 : vector<8x1xi32>
    %c0_i32_1 = arith.constant 0 : i32
    %7 = vector.broadcast %c0_i32_1 : i32 to vector<8x1xi32>
    %8 = arith.cmpi ne, %6, %7 : vector<8x1xi32>
    %c0_i32_2 = arith.constant 0 : i32
    %9 = vector.broadcast %c0_i32_2 : i32 to vector<8x1xi32>
    %10 = arith.cmpi slt, %6, %9 : vector<8x1xi32>
    %c0_i32_3 = arith.constant 0 : i32
    %11 = arith.cmpi slt, %4, %c0_i32_3 : i32
    %12 = vector.broadcast %11 : i1 to vector<8x1xi1>
    %13 = vector.broadcast %12 : vector<8x1xi1> to vector<8x1xi1>
    %14 = arith.xori %10, %13 : vector<8x1xi1>
    %15 = arith.andi %14, %8 : vector<8x1xi1>
    %16 = vector.broadcast %4 : i32 to vector<8x1xi32>
    %17 = arith.addi %6, %16 : vector<8x1xi32>
    %18 = arith.select %15, %17, %6 : vector<8x1xi1>, vector<8x1xi32>
    %c3_i32 = arith.constant 3 : i32
    %19 = vector.broadcast %c3_i32 : i32 to vector<8x1xi32>
    %20 = arith.cmpi slt, %18, %19 : vector<8x1xi32>
    %21 = arith.extui %20 : vector<8x1xi1> to vector<8x1xi32>
    %22 = arith.sitofp %21 : vector<8x1xi32> to vector<8x1xf32>
    %c1_i32_4 = arith.constant 1 : i32
    %23 = vector.broadcast %c1_i32_4 : i32 to vector<8x1xi32>
    %24 = arith.cmpi sge, %18, %23 : vector<8x1xi32>
    %25 = arith.extui %24 : vector<8x1xi1> to vector<8x1xi32>
    %26 = arith.sitofp %25 : vector<8x1xi32> to vector<8x1xf32>
    %c2_i32 = arith.constant 2 : i32
    %27 = vector.broadcast %c2_i32 : i32 to vector<8x1xi32>
    %28 = arith.cmpi slt, %18, %27 : vector<8x1xi32>
    %29 = arith.extui %28 : vector<8x1xi1> to vector<8x1xi32>
    %30 = arith.sitofp %29 : vector<8x1xi32> to vector<8x1xf32>
    %c2_i32_5 = arith.constant 2 : i32
    %31 = vector.broadcast %c2_i32_5 : i32 to vector<8x1xi32>
    %32 = arith.cmpi sge, %18, %31 : vector<8x1xi32>
    %33 = arith.extui %32 : vector<8x1xi1> to vector<8x1xi32>
    %34 = arith.sitofp %33 : vector<8x1xi32> to vector<8x1xf32>
    %c7_i32 = arith.constant 7 : i32
    %35 = tpu.dynamic_rotate %1 by %c7_i32 dim 0 : vector<8x128xf32>, i32 -> vector<8x128xf32>
    %c1_i32_6 = arith.constant 1 : i32
    %36 = tpu.dynamic_rotate %1 by %c1_i32_6 dim 0 : vector<8x128xf32>, i32 -> vector<8x128xf32>
    %37 = vector.broadcast %22 : vector<8x1xf32> to vector<8x128xf32>
    %38 = arith.mulf %37, %35 : vector<8x128xf32>
    %39 = arith.addf %1, %38 : vector<8x128xf32>
    %40 = vector.broadcast %26 : vector<8x1xf32> to vector<8x128xf32>
    %41 = arith.mulf %40, %36 : vector<8x128xf32>
    %42 = arith.addf %39, %41 : vector<8x128xf32>
    %c6_i32 = arith.constant 6 : i32
    %43 = tpu.dynamic_rotate %1 by %c6_i32 dim 0 : vector<8x128xf32>, i32 -> vector<8x128xf32>
    %c2_i32_7 = arith.constant 2 : i32
    %44 = tpu.dynamic_rotate %1 by %c2_i32_7 dim 0 : vector<8x128xf32>, i32 -> vector<8x128xf32>
    %45 = vector.broadcast %30 : vector<8x1xf32> to vector<8x128xf32>
    %46 = arith.mulf %45, %43 : vector<8x128xf32>
    %47 = arith.addf %42, %46 : vector<8x128xf32>
    %48 = vector.broadcast %34 : vector<8x1xf32> to vector<8x128xf32>
    %49 = arith.mulf %48, %44 : vector<8x128xf32>
    %50 = arith.addf %47, %49 : vector<8x128xf32>
    %cst = arith.constant 1.500000e-04 : f32
    %51 = vector.broadcast %cst : f32 to vector<8x128xf32>
    %52 = arith.mulf %50, %51 : vector<8x128xf32>
    %cst_8 = arith.constant 1.500000e+00 : f32
    %53 = vector.broadcast %cst_8 : f32 to vector<8x128xf32>
    %54 = arith.addf %52, %53 : vector<8x128xf32>
    %55 = tpu.reciprocal %54 {approx = true} : vector<8x128xf32> -> vector<8x128xf32>
    %56 = arith.mulf %54, %55 : vector<8x128xf32>
    %cst_9 = arith.constant 2.000000e+00 : f32
    %57 = vector.broadcast %cst_9 : f32 to vector<8x128xf32>
    %58 = arith.subf %57, %56 : vector<8x128xf32>
    %59 = arith.mulf %55, %58 : vector<8x128xf32>
    %60 = arith.mulf %0, %59 : vector<8x128xf32>
    %c0_10 = arith.constant 0 : index
    %c0_11 = arith.constant 0 : index
    %61 = vector.load %arg3[%c0_10, %c0_11] : memref<8x128xf32, #tpu.memory_space<vmem>>, vector<8x128xf32>
    tpu.vector_store %arg3[%c0_10, %c0_11], %60 {strides = array<i32>} : memref<8x128xf32, #tpu.memory_space<vmem>>, vector<8x128xf32>,
    return
  }
  func.func @transform_0(%arg0: i32, %arg1: i32) -> (i32, i32) {
    %c0_i32 = arith.constant 0 : i32
    return %arg0, %arg1 : i32, i32
  }
  func.func @transform_1(%arg0: i32, %arg1: i32) -> (i32, i32) {
    %c0_i32 = arith.constant 0 : i32
    return %arg0, %arg1 : i32, i32
  }
}

</mosaic_0001>

<bundles_post_ra>
// kernel: tpu_custom_call.1
= control target key start
LH: loop header
LB: loop body
LE: loop exit
PB: predicated region body
PF: predicated region fallthrough
CT: control target
= control target key end

     0   :  { %6 = vsyncpa [#allocation3], 0  ;;  %s631_s0 = inlined_call_operand.hbm [shape: f32[8,256], index: 0, kind: input, shape index: {}]   ;;  %s632_s1 = inlined_call_operand.hbm [shape: f32[8,256], index: 1, kind: output, shape index: {}]  }
   0x1   :  { %8 = vsyncpa [#allocation3 + $0x1], 0 }
   0x2   :  { %9 = vsyncpa [#allocation4], 0 }
   0x3   :  { %11 = vsyncpa [#allocation4 + $0x1], 0  ;;  %s507_s6 = smov 0   ;;  %s509_s7 = smov 0  }
   0x4   :  { %s511_s8 = smov 0   ;;  %s513_s9 = smov 0  }
   0x5   :  { %s515_s10 = smov 0   ;;  %s517_s11 = smov 0  }
   0x6 LB: > { %s300_s12 = sadd.s32 4294967295, %s494_s11   ;;  %s301_s13 = sadd.s32 4294967294, %s494_s11   ;;  %s494_s11 = sphi %s517_s11, %s17_s11   ;;  %s490_s10 = sphi %s515_s10, %s641_s10   ;;  %s486_s9 = sphi %s513_s9, %s640_s9   ;;  %s482_s8 = sphi %s511_s8, %s639_s8   ;;  %s478_s7 = sphi %s509_s7, %s638_s7   ;;  %s474_s6 = sphi %s507_s6, %s637_s6  }
   0x7   : > { %s26_s14 = sadd.s32 1, %s490_s10  ;;  %s38_s15 = sadd.s32 1, %s482_s8 }
   0x8   : > { %p27_p0 = scmp.ge.s32.totalorder %s26_s14, 2  ;;  %p45_p1 = scmp.ne.s32.totalorder %s482_s8, %s478_s7 }
   0x9   : > { %p46_p2 = scmp.eq.s32.totalorder %s494_s11, 0  ;;  %p51_p3 = scmp.ne.s32.totalorder %s478_s7, %s474_s6 }
   0xa   : > { %s643_s14 = smov (%p27_p0, %s26_s14), 0  ;;  %p52_p5 = scmp.eq.s32.totalorder %s300_s12, 0 }
   0xb   : > { %p548_p4 = por %p46_p2, %p45_p1  ;;  %s34_s17 = ssub.s32 %s490_s10, %s643_s14 }
   0xc   : > { %p77_p6 = scmp.eq.s32.totalorder %s300_s12, 1  ;;  %p36_p7 = scmp.eq.s32.totalorder %s34_s17, 0 }
   0xd   : > { %p554_p8 = por %p52_p5, %p51_p3  ;;  %p83_p10 = scmp.eq.s32.totalorder %s301_s13, 1 }
   0xe   : > { %p558_p9 = por %p77_p6, %p45_p1  ;;  %p303_p12 = scmp.ge.s32.totalorder %s494_s11, 2 }
   0xf   : > { %s563_s20 = scalar_select %p36_p7, %s482_s8, %s38_s15  }
  0x10   : > { %p565_p11 = por %p83_p10, %p51_p3  ;;  %p329_p13 = scmp.lt.s32.totalorder %s494_s11, 2 }
  0x11   : > { %s103_s22 = sand.u32 1, %s482_s8   ;;  %s305_s24 = sshll.u32 %s490_s10, 3 }
  0x12   : > { %s304_s23 = sshll.u32 %s103_s22, 3  ;;  %s113_s27 = scalar_lea.hbm %s631_s0, %s305_s24 }
  0x13   : > { %s107_s28 = scalar_lea.vmem [#allocation2], %s304_s23  ;;  %s115_s30 = sshll.u32 %s113_s27, 4  ;;  %s116_s30 = int_to_ptr.hbm [resolvable:$true] %s115_s30 }
  0x14   : > { %s117_s29 = sshll.u32 %s107_s28, 4  ;;  %p322_p0 = pnand %p329_p13, %p548_p4  ;;  %s118_s29 = int_to_ptr.vmem [resolvable:$true] %s117_s29 }
  0x15   : > { %p306_p1 = scmp.ge.s32.totalorder %s494_s11, 1  ;;  %p122_p2 = scmp.lt.s32.totalorder %s494_s11, 3 }
  0x16   : > { %s104_s2 = scalar_lea.sflag [#allocation3], %s103_s22 }
  0x17   : > { %324 = dma.hbm_to_vmem [thread:$0]  (!%p322_p0), %s116_s30, 128, %s118_s29, %s104_s2  }
  0x18   : > { %p123_p3 = pnand %p306_p1, %p122_p2 }
  0x19   : > { %s581_s3 = sand.u32 (!%p123_p3), 1, %s478_s7  }
  0x1a   : > { %126 = sbr.rel (%p123_p3) target bundleno = 72 (0x48), region = 24  ;;  %s307_s4 = sshll.u32 (!%p123_p3), %s581_s3, 3 }
  0x1b   : > { %s129_s5 = scalar_lea.sflag (!%p123_p3), [#allocation3], %s581_s3  ;;  %s132_s12 = scalar_lea.vmem (!%p123_p3), [#allocation2], %s307_s4 }
  0x1f   : > { %465 = dma.done.wait (%p554_p8), %s129_s5, 128  }
  0x20   : > { %467 = vsyncadd (%p554_p8), %s129_s5, 4294967168  ;;  %v154_v0 = vlaneseq  ;;  %v152_v3 = vld [vmem:[%s132_s12] sm:$0xff]  ;;  %v496_v5 = vmov 0.0   ;;  %s314_s13 = sshll.u32 %s486_s9, 3  ;;  %s151_s18 = scalar_lea.vmem [#allocation5], %s307_s4 }
  0x21   : > { %v153_v4 = vmul.f32 %v152_v3, %v152_v3  ;;  %s213_s17 = scalar_lea.hbm %s632_s1, %s314_s13  ;;  %s215_s22 = sshll.u32 %s151_s18, 4  ;;  %s216_s22 = int_to_ptr.vmem [resolvable:$true] %s215_s22 }
  0x22   : > { %v155_v1 = vshrl.u32 %v154_v0, 7  ;;  %s217_s23 = sshll.u32 %s213_s17, 4  ;;  %s201_s24 = scalar_lea.sflag [#allocation4], %s581_s3  ;;  %s218_s23 = int_to_ptr.hbm [resolvable:$true] %s217_s23 }
  0x23   : > { %v180_v8 = vrot.slane %v153_v4, 1  ;;  %v181_v9 = vrot.slane %v153_v4, 7  ;;  %v186_v10 = vrot.slane %v153_v4, 2  ;;  %v187_v14 = vrot.slane %v153_v4, 6  ;;  %s426_s25 = sshra.s32 %s218_s23, 4  ;;  %s432_s28 = scalar_lea.hbm %s632_s1, 16  ;;  %s427_s25 = int_to_ptr.hbm [resolvable:$true] %s426_s25 }
  0x24   : > { %v160_v2 = vand.u32 3, %v155_v1  ;;  %s428_s9 = scalar_lea.hbm %s427_s25, 8  ;;  %p433_p7 = scmp.lt.s32.totalorder %s427_s25, %s632_s1 }
  0x25   : > { %p429_p4 = scmp.ne.s32.totalorder %s427_s25, %s428_s9  ;;  %p434_p8 = scmp.lt.s32.totalorder %s432_s28, %s428_s9 }
  0x26   : > { %vm168_vm0 = vcmp.lt.s32.totalorder %v160_v2, 3  ;;  %vm171_vm1 = vcmp.ge.s32.totalorder %v160_v2, 1  ;;  %vm174_vm2 = vcmp.lt.s32.totalorder %v160_v2, 2  ;;  %vm177_vm3 = vcmp.ge.s32.totalorder %v160_v2, 2 }
  0x27   : > { %v309_v6 = vsel %vm168_vm0, 1.0, %v496_v5  ;;  %v310_v7 = vsel %vm171_vm1, 1.0, %v496_v5  ;;  %v311_v11 = vsel %vm174_vm2, 1.0, %v496_v5  ;;  %v312_v15 = vsel %vm177_vm3, 1.0, %v496_v5  ;;  %p430_p5 = pnand %p429_p4, %p558_p9  ;;  %p435_p10 = por %p434_p8, %p433_p7 }
  0x28   : > { %v182_v12 = vmul.f32 %v309_v6, %v180_v8  ;;  %v184_v13 = vmul.f32 %v310_v7, %v181_v9  ;;  %v188_v17 = vmul.f32 %v311_v11, %v186_v10  ;;  %v190_v19 = vmul.f32 %v312_v15, %v187_v14 }
  0x29   : > { %p431_p6 = pneg %p430_p5 }
  0x2a   : > { %v183_v16 = vadd.f32 %v182_v12, %v153_v4 }
  0x2b   : > { %p436_p13 = pnand %p435_p10, %p431_p6 }
  0x2c   : > { %v185_v18 = vadd.f32 %v184_v13, %v183_v16 }
  0x2e   : > { %v189_v20 = vadd.f32 %v188_v17, %v185_v18 }
  0x30   : > { %v191_v21 = vadd.f32 %v190_v19, %v189_v20 }
  0x32   : > { %v192_v22 = vmul.f32 0.00015, %v191_v21 }
  0x34   : > { %v193_v23 = vadd.f32 1.5, %v192_v22 }
  0x36   : > { %380 = vrcp.f32 %v193_v23 }
  0x3c   : > { %v381_v24 = vpop.eup %380 }
  0x3d   : > { %v195_v25 = vmul.f32 %v381_v24, %v193_v23 }
  0x3f   : > { %v196_v26 = vsub.f32 2.0, %v195_v25 }
  0x41   : > { %v197_v27 = vmul.f32 %v381_v24, %v196_v26 }
  0x43   : > { %v198_v28 = vmul.f32 %v197_v27, %v152_v3 }
  0x45   : > { %199 = vst [vmem:[%s151_s18] sm:$0xff] %v198_v28 }
  0x46   : > { %439 = shalt.err (!%p436_p13)
}
  0x47   : > { %319 = dma.vmem_to_hbm [thread:$0]  (%p558_p9), %s216_s22, 128, %s218_s23, %s201_s24  }
  0x48 PF: > { %s229_s2 = sand.u32 1, %s474_s6   ;;  %p326_p0 = pnand %p303_p12, %p565_p11 }
  0x49   : > { %s230_s3 = scalar_lea.sflag [#allocation4], %s229_s2 }
  0x4a   : > { %p327_p1 = pneg %p326_p0 }
  0x4c   : > { %469 = dma.done.wait (%p327_p1), %s230_s3, 128  }
  0x4d   : > { %471 = vsyncadd (%p327_p1), %s230_s3, 4294967168  ;;  %s17_s11 = sadd.s32 1, %s494_s11   ;;  %s637_s6 = smov %s478_s7 }
  0x4e   : > { %p14_p2 = scmp.ge.s32.totalorder %s17_s11, 4   ;;  %s638_s7 = smov %s482_s8 }
  0x4f   : > { %s639_s8 = smov %s563_s20  ;;  %s640_s9 = smov %s490_s10 }
  0x50   : > { %s641_s10 = smov %s643_s14  ;;  %16 = sbr.rel (!%p14_p2) target bundleno = 6 (0x6), region = 69 }
  0x55   :  { %236 = vsyncpa [#allocation3], 1 }
  0x56   :  { %238 = vsyncpa [#allocation3 + $0x1], 1 }
  0x57   :  { %239 = vsyncpa [#allocation4], 1 }
  0x58   :  { %241 = vsyncpa [#allocation4 + $0x1], 1 }

</bundles_post_ra>
